<compile_context>
chip_gen: v7x
topology: tpu7x:2x2x1
jax: 0.10.0
libtpu: 0.0.40
codegen_flags: <defaults>
</compile_context>

<pallas_src>
import jax
import jax.numpy as jnp
from jax.experimental import pallas as pl
from jax.experimental.pallas import tpu as pltpu

# ----------------------------------------------------------------------------
# helpers
# ----------------------------------------------------------------------------

def _round_up(x, m):
    return ((x + m - 1) // m) * m


def _pad_axis(a, axis, mult, value=0.0):
    size = a.shape[axis]
    pad = (-size) % mult
    if pad == 0:
        return a
    widths = [(0, 0)] * a.ndim
    widths[axis] = (0, pad)
    return jnp.pad(a, widths, constant_values=value)


# ----------------------------------------------------------------------------
# tile selection (layer-aware)
# ----------------------------------------------------------------------------

def _pick_tiles(M, K, N):
    """Pick (tm, tn, tk, pad_k).

    * tn: 256 on wide (cout>=512) layers (v6e/v7x 2x256x256 MXU), else 128.
    * tk: collapse the whole K reduction into one grid step whenever the
      double-buffered bf16 weight block fits a conservative ~8 MiB budget
      (keeps headroom vs. v7x's 64 MiB physical / 32 MiB scoped VMEM).
    * tm: as large as the layer allows, but keep >=2 parallel grid blocks
      overall so v7x's two TensorCores both get work.
    """
    W_BUDGET = 8 * 1024 * 1024  # double-buffered bf16 weight block budget

    Np = _round_up(N, 128)
    tn = 256 if (Np >= 512 and Np % 256 == 0) else 128
    ntn = Np // tn

    if 2 * K * tn * 2 <= W_BUDGET:
        tk = K            # single K step; full-dim block => no K padding needed
        pad_k = False
    else:
        tk = max(128, (W_BUDGET // (2 * tn * 2)) // 128 * 128)
        pad_k = (K % tk != 0)

    Mp = _round_up(M, 8)
    if Mp >= 1024:
        tm = 512
    elif Mp >= 256:
        tm = 256
    else:
        tm = Mp
    # keep at least two parallel grid blocks when the M axis can be split
    if pl.cdiv(Mp, tm) * ntn < 2 and tm >= 16 and (tm // 2) % 8 == 0:
        tm //= 2
    return tm, tn, tk, pad_k


# ----------------------------------------------------------------------------
# Pallas kernels
# ----------------------------------------------------------------------------

def _make_matmul_kernel(apply_relu, has_residual, multi_k):
    """Tiled matmul with fused BN scale/bias (+ residual) (+ ReLU) epilogue.

    bf16 operands, f32 accumulation, f32 epilogue, bf16 store.
    """

    def kernel(*refs):
        if multi_k:
            if has_residual:
                x_ref, w_ref, s_ref, b_ref, r_ref, o_ref, acc_ref = refs
            else:
                x_ref, w_ref, s_ref, b_ref, o_ref, acc_ref = refs
                r_ref = None

            @pl.when(pl.program_id(2) == 0)
            def _():
                acc_ref[...] = jnp.zeros_like(acc_ref)

            acc_ref[...] += jnp.dot(
                x_ref[...], w_ref[...], preferred_element_type=jnp.float32
            )

            @pl.when(pl.program_id(2) == pl.num_programs(2) - 1)
            def _():
                y = acc_ref[...] * s_ref[...] + b_ref[...]
                if r_ref is not None:
                    y = y + r_ref[...].astype(jnp.float32)
                if apply_relu:
                    y = jnp.maximum(y, 0.0)
                o_ref[...] = y.astype(o_ref.dtype)
        else:
            # K axis collapsed into a single step: no accumulator scratch.
            if has_residual:
                x_ref, w_ref, s_ref, b_ref, r_ref, o_ref = refs
            else:
                x_ref, w_ref, s_ref, b_ref, o_ref = refs
                r_ref = None
            y = jnp.dot(x_ref[...], w_ref[...],
                        preferred_element_type=jnp.float32)
            y = y * s_ref[...] + b_ref[...]
            if r_ref is not None:
                y = y + r_ref[...].astype(jnp.float32)
            if apply_relu:
                y = jnp.maximum(y, 0.0)
            o_ref[...] = y.astype(o_ref.dtype)

    return kernel


def matmul_bn(patches, w2d, scale, bias, residual=None, relu=True):
    """out(bf16) = maybe_relu(patches @ w2d * scale + bias [+ residual])."""
    M, K = patches.shape
    Kw, N = w2d.shape
    assert K == Kw
    tm, tn, tk, pad_k = _pick_tiles(M, K, N)

    # pad only the axes that are not already tile-aligned
    xp = patches if M % tm == 0 else _pad_axis(patches, 0, tm)
    wp = w2d
    if pad_k:
        xp = _pad_axis(xp, 1, tk)
        wp = _pad_axis(wp, 0, tk)
    if N % tn != 0:
        wp = _pad_axis(wp, 1, tn)
    sp = scale.reshape(1, -1).astype(jnp.float32)
    bp = bias.reshape(1, -1).astype(jnp.float32)
    if N % tn != 0:
        sp = _pad_axis(sp, 1, tn)
        bp = _pad_axis(bp, 1, tn)

    has_res = residual is not None
    rp = None
    if has_res:
        rp = residual
        if M % tm != 0:
            rp = _pad_axis(rp, 0, tm)
        if N % tn != 0:
            rp = _pad_axis(rp, 1, tn)
        rp = rp.astype(jnp.bfloat16)

    # bf16 operands (MXU-native, half the DMA bytes); f32 accumulate/epilogue.
    xp = xp.astype(jnp.bfloat16)
    wp = wp.astype(jnp.bfloat16)

    Mp, Kp = xp.shape
    Np = wp.shape[1]
    nm, nn, nk = Mp // tm, Np // tn, Kp // tk
    multi_k = nk > 1

    if multi_k:
        in_specs = [
            pl.BlockSpec((tm, tk), lambda i, j, k: (i, k)),
            pl.BlockSpec((tk, tn), lambda i, j, k: (k, j)),
            pl.BlockSpec((1, tn), lambda i, j, k: (0, j)),
            pl.BlockSpec((1, tn), lambda i, j, k: (0, j)),
        ]
        if has_res:
            in_specs.append(pl.BlockSpec((tm, tn), lambda i, j, k: (i, j)))
        out_spec = pl.BlockSpec((tm, tn), lambda i, j, k: (i, j))
        grid = (nm, nn, nk)
        scratch = [pltpu.VMEM((tm, tn), jnp.float32)]
        dims = ("parallel", "parallel", "arbitrary")
    else:
        in_specs = [
            pl.BlockSpec((tm, tk), lambda i, j: (i, 0)),
            pl.BlockSpec((tk, tn), lambda i, j: (0, j)),
            pl.BlockSpec((1, tn), lambda i, j: (0, j)),
            pl.BlockSpec((1, tn), lambda i, j: (0, j)),
        ]
        if has_res:
            in_specs.append(pl.BlockSpec((tm, tn), lambda i, j: (i, j)))
        out_spec = pl.BlockSpec((tm, tn), lambda i, j: (i, j))
        grid = (nm, nn)
        scratch = []
        dims = ("parallel", "parallel")

    cost = pl.CostEstimate(
        flops=2 * Mp * Kp * Np,
        transcendentals=0,
        bytes_accessed=2 * (Mp * Kp + Kp * Np
                            + (2 if has_res else 1) * Mp * Np) + 8 * Np,
    )

    inputs = [xp, wp, sp, bp] + ([rp] if has_res else [])
    out = pl.pallas_call(
        _make_matmul_kernel(relu, has_res, multi_k),
        out_shape=jax.ShapeDtypeStruct((Mp, Np), jnp.bfloat16),
        grid_spec=pltpu.PrefetchScalarGridSpec(
            num_scalar_prefetch=0,
            grid=grid,
            in_specs=in_specs,
            out_specs=out_spec,
            scratch_shapes=scratch,
        ),
        compiler_params=pltpu.CompilerParams(dimension_semantics=dims),
        cost_estimate=cost,
    )(*inputs)
    if Mp != M or Np != N:
        out = out[:M, :N]
    return out


def _maxpool_kernel(*refs):
    o_ref = refs[-1]
    y = refs[0][...]
    for r in refs[1:-1]:
        y = jnp.maximum(y, r[...])
    o_ref[...] = y


def maxpool_3x3_s2(x):
    """MaxPool2d(kernel=3, stride=2, padding=1) on NHWC via a Pallas max.

    The 9 shifted window views are presented lane-dense as (N*Ho, Wo*C) so
    the output store is a full-vreg vst instead of a masked C=64 store.
    """
    N, H, W, C = x.shape
    Ho = (H + 2 - 3) // 2 + 1
    Wo = (W + 2 - 3) // 2 + 1
    neg = jnp.finfo(x.dtype).min
    xp = jnp.pad(x, ((0, 0), (1, 1), (1, 1), (0, 0)), constant_values=neg)

    views = []
    for i in range(3):
        for j in range(3):
            v = xp[:, i:i + 2 * (Ho - 1) + 1:2,
                   j:j + 2 * (Wo - 1) + 1:2, :]
            views.append(v.reshape(N * Ho, Wo * C))   # lane-dense last dim

    M2, L = N * Ho, Wo * C
    out = pl.pallas_call(
        _maxpool_kernel,
        out_shape=jax.ShapeDtypeStruct((M2, L), x.dtype),
        grid=(1,),
        in_specs=[pl.BlockSpec((M2, L), lambda i: (0, 0))] * 9,
        out_specs=pl.BlockSpec((M2, L), lambda i: (0, 0)),
        compiler_params=pltpu.CompilerParams(
            dimension_semantics=("arbitrary",)),
    )(*views)
    return out.reshape(N, Ho, Wo, C)


# ----------------------------------------------------------------------------
# conv + bn (+ residual) (+ relu) wrapper: bf16 im2col glue + Pallas matmul
# ----------------------------------------------------------------------------

def conv_bn_act(x, w, scale, bias, stride, padding, relu=True, residual=None):
    # TODO(synk): an implicit-GEMM kernel (9-tap shifted reads via index_map /
    # manual DMA) would avoid the im2col HBM blow-up entirely; at this size the
    # bf16 im2col is already cheap, so we only halve the traffic via bf16.
    x = x.astype(jnp.bfloat16)
    w = w.astype(jnp.bfloat16)
    N, H, W, C = x.shape
    kh, kw, cin, cout = w.shape
    assert cin == C
    Ho = (H + 2 * padding - kh) // stride + 1
    Wo = (W + 2 * padding - kw) // stride + 1

    xp = jnp.pad(x, ((0, 0), (padding, padding), (padding, padding), (0, 0)))
    cols = []
    for i in range(kh):
        for j in range(kw):
            cols.append(xp[:, i:i + stride * (Ho - 1) + 1:stride,
                           j:j + stride * (Wo - 1) + 1:stride, :])
    patches = jnp.concatenate(cols, axis=-1).reshape(N * Ho * Wo, kh * kw * cin)
    w2d = w.reshape(kh * kw * cin, cout)
    res2d = (residual.reshape(N * Ho * Wo, cout)
             if residual is not None else None)

    out = matmul_bn(patches, w2d, scale, bias, residual=res2d, relu=relu)
    return out.reshape(N, Ho, Wo, cout)


# ----------------------------------------------------------------------------
# ResNet-34 backbone (children [0:-2], conv1 stride forced to 1)
# ----------------------------------------------------------------------------

CFG = [(64, 3, 1), (128, 4, 2), (256, 6, 2), (512, 3, 2)]  # (cout, nblocks, stride0)


def block_plan():
    plan = []
    in_c = 64
    for out_c, n, s0 in CFG:
        for b in range(n):
            plan.append((in_c, out_c, s0 if b == 0 else 1))
            in_c = out_c
    return plan


def _he_init(key, shape):
    fan_in = shape[0] * shape[1] * shape[2]
    w = jax.random.normal(key, shape, jnp.float32) * jnp.sqrt(2.0 / fan_in)
    return w.astype(jnp.bfloat16)


def _bn_fold(c, eps=1e-5):
    gamma = jnp.ones((c,), jnp.float32)
    beta = jnp.zeros((c,), jnp.float32)
    mean = jnp.zeros((c,), jnp.float32)
    var = jnp.ones((c,), jnp.float32)
    scale = gamma * jax.lax.rsqrt(var + eps)
    bias = beta - mean * scale
    return scale, bias


def init_params(key):
    keys = iter(jax.random.split(key, 64))
    params = {}
    params['conv1_w'] = _he_init(next(keys), (7, 7, 3, 64))
    s, b = _bn_fold(64)
    params['bn1_scale'], params['bn1_bias'] = s, b

    blocks = []
    for in_c, out_c, stride in block_plan():
        blk = {}
        blk['conv1_w'] = _he_init(next(keys), (3, 3, in_c, out_c))
        blk['bn1_scale'], blk['bn1_bias'] = _bn_fold(out_c)
        blk['conv2_w'] = _he_init(next(keys), (3, 3, out_c, out_c))
        blk['bn2_scale'], blk['bn2_bias'] = _bn_fold(out_c)
        if stride != 1 or in_c != out_c:
            blk['ds_w'] = _he_init(next(keys), (1, 1, in_c, out_c))
            blk['ds_scale'], blk['ds_bias'] = _bn_fold(out_c)
        blocks.append(blk)
    params['blocks'] = blocks
    return params


def basic_block(x, blk, stride):
    # TODO(synk): the two block convs (+downsample) could be fused into one
    # pallas_call via pltpu.emit_pipeline to cut launch overhead further.
    if 'ds_w' in blk:
        identity = conv_bn_act(x, blk['ds_w'], blk['ds_scale'], blk['ds_bias'],
                               stride=stride, padding=0, relu=False)
    else:
        identity = x
    y = conv_bn_act(x, blk['conv1_w'], blk['bn1_scale'], blk['bn1_bias'],
                    stride=stride, padding=1, relu=True)
    y = conv_bn_act(y, blk['conv2_w'], blk['bn2_scale'], blk['bn2_bias'],
                    stride=1, padding=1, relu=True, residual=identity)
    return y


@jax.jit
def resnet34_forward(params, x_nchw):
    x = jnp.transpose(x_nchw, (0, 2, 3, 1)).astype(jnp.bfloat16)  # -> NHWC bf16
    # features[0..2]: conv1 (stride forced to 1) + bn1 + relu
    x = conv_bn_act(x, params['conv1_w'], params['bn1_scale'], params['bn1_bias'],
                    stride=1, padding=3, relu=True)
    r_relu = x                       # results[0]  (after index 2)
    # features[3]: maxpool 3x3 / stride 2 / pad 1
    x = maxpool_3x3_s2(x)

    plan = block_plan()
    results = []
    bi = 0
    for li, (out_c, n, s0) in enumerate(CFG):
        for _ in range(n):
            _, _, stride = plan[bi]
            x = basic_block(x, params['blocks'][bi], stride)
            bi += 1
        if li < 3:
            results.append(x)        # results[1..3]: layer1, layer2, layer3
    outs = [r_relu] + results + [x]  # final x after layer4
    # back to PyTorch-facing NCHW float32
    return tuple(jnp.transpose(o, (0, 3, 1, 2)).astype(jnp.float32)
                 for o in outs)


# ----------------------------------------------------------------------------
# main
# ----------------------------------------------------------------------------

if __name__ == "__main__":
    key = jax.random.PRNGKey(0)
    pkey, xkey = jax.random.split(key)
    params = init_params(pkey)

    x = jax.random.normal(xkey, (2, 3, 32, 32), jnp.float32)  # NCHW like PyTorch

    # correctness spot-check of the fused bf16 conv+bn+relu Pallas path against
    # an XLA conv on the same bf16 operands with f32 accumulation.
    x_nhwc = jnp.transpose(x, (0, 2, 3, 1)).astype(jnp.bfloat16)
    ref = jax.lax.conv_general_dilated(
        x_nhwc, params['conv1_w'], (1, 1), [(3, 3), (3, 3)],
        dimension_numbers=('NHWC', 'HWIO', 'NHWC'),
        preferred_element_type=jnp.float32)
    ref = jnp.maximum(ref * params['bn1_scale'] + params['bn1_bias'], 0.0)
    got = conv_bn_act(x_nhwc, params['conv1_w'], params['bn1_scale'],
                      params['bn1_bias'], stride=1, padding=3,
                      relu=True).astype(jnp.float32)
    max_err = float(jnp.max(jnp.abs(got - ref)))
    assert jnp.allclose(got, ref, atol=2e-2, rtol=2e-2), \
        f"conv1 mismatch, max abs err {max_err}"

    outs = resnet34_forward(params, x)
    outs = jax.block_until_ready(outs)

    # expected shapes: (2,64,32,32), (2,64,16,16), (2,128,8,8), (2,256,4,4), (2,512,2,2)
    assert outs[0].shape == (2, 64, 32, 32)
    assert outs[1].shape == (2, 64, 16, 16)
    assert outs[2].shape == (2, 128, 8, 8)
    assert outs[3].shape == (2, 256, 4, 4)
    assert outs[4].shape == (2, 512, 2, 2)

    print("KERNEL_OK")
</pallas_src>

<mosaic_0001>
module attributes {stable_mosaic.version = 11 : i64} {
  func.func @kernel(%arg0: i32, %arg1: i32, %arg2: memref<512x147xbf16, #tpu.memory_space<vmem>>, %arg3: memref<147x128xbf16, #tpu.memory_space<vmem>>, %arg4: memref<1x128xf32, #tpu.memory_space<vmem>>, %arg5: memref<1x128xf32, #tpu.memory_space<vmem>>, %arg6: memref<512x128xbf16, #tpu.memory_space<vmem>>) attributes {dimension_semantics = [#tpu.dimension_semantics<parallel>, #tpu.dimension_semantics<parallel>], iteration_bounds = array<i64: 4, 1>, scalar_prefetch = 0 : i64, scratch_operands = 0 : i64, tpu.core_type = #tpu.core_type<tc>, window_params = [{transform_indices = @transform_0, window_bounds = array<i64: 512, 147>}, {transform_indices = @transform_1, window_bounds = array<i64: 147, 128>}, {transform_indices = @transform_2, window_bounds = array<i64: 1, 128>}, {transform_indices = @transform_3, window_bounds = array<i64: 1, 128>}, {transform_indices = @transform_4, window_bounds = array<i64: 512, 128>}]} {
    %c0 = arith.constant 0 : index
    %c0_0 = arith.constant 0 : index
    %0 = vector.load %arg2[%c0, %c0_0] : memref<512x147xbf16, #tpu.memory_space<vmem>>, vector<512x147xbf16>
    %c0_1 = arith.constant 0 : index
    %c0_2 = arith.constant 0 : index
    %1 = vector.load %arg3[%c0_1, %c0_2] : memref<147x128xbf16, #tpu.memory_space<vmem>>, vector<147x128xbf16>
    %cst = arith.constant dense<0.000000e+00> : vector<512x128xf32>
    %2 = tpu.matmul %0, %1, %cst {dimension_numbers = #tpu.dot_dimension_numbers<[1], [0], [0], [1], [0, 0, 1, 1], [], []>} : vector<512x147xbf16>, vector<147x128xbf16>, vector<512x128xf32> -> vector<512x128xf32>
    %c0_3 = arith.constant 0 : index
    %c0_4 = arith.constant 0 : index
    %3 = vector.load %arg4[%c0_3, %c0_4] : memref<1x128xf32, #tpu.memory_space<vmem>>, vector<1x128xf32>
    %4 = vector.broadcast %3 : vector<1x128xf32> to vector<512x128xf32>
    %5 = arith.mulf %2, %4 : vector<512x128xf32>
    %c0_5 = arith.constant 0 : index
    %c0_6 = arith.constant 0 : index
    %6 = vector.load %arg5[%c0_5, %c0_6] : memref<1x128xf32, #tpu.memory_space<vmem>>, vector<1x128xf32>
    %7 = vector.broadcast %6 : vector<1x128xf32> to vector<512x128xf32>
    %8 = arith.addf %5, %7 : vector<512x128xf32>
    %cst_7 = arith.constant 0.000000e+00 : f32
    %9 = vector.broadcast %cst_7 : f32 to vector<512x128xf32>
    %10 = arith.maximumf %8, %9 : vector<512x128xf32>
    %11 = arith.truncf %10 : vector<512x128xf32> to vector<512x128xbf16>
    %c0_8 = arith.constant 0 : index
    %c0_9 = arith.constant 0 : index
    %12 = vector.load %arg6[%c0_8, %c0_9] : memref<512x128xbf16, #tpu.memory_space<vmem>>, vector<512x128xbf16>
    tpu.vector_store %arg6[%c0_8, %c0_9], %11 {strides = array<i32>} : memref<512x128xbf16, #tpu.memory_space<vmem>>, vector<512x128xbf16>,
    return
  }
  func.func @transform_0(%arg0: i32, %arg1: i32) -> (i32, i32) {
    %c0_i32 = arith.constant 0 : i32
    %c0_i32_0 = arith.constant 0 : i32
    return %arg0, %c0_i32 : i32, i32
  }
  func.func @transform_1(%arg0: i32, %arg1: i32) -> (i32, i32) {
    %c0_i32 = arith.constant 0 : i32
    %c0_i32_0 = arith.constant 0 : i32
    return %c0_i32, %arg1 : i32, i32
  }
  func.func @transform_2(%arg0: i32, %arg1: i32) -> (i32, i32) {
    %c0_i32 = arith.constant 0 : i32
    %c0_i32_0 = arith.constant 0 : i32
    return %c0_i32, %arg1 : i32, i32
  }
  func.func @transform_3(%arg0: i32, %arg1: i32) -> (i32, i32) {
    %c0_i32 = arith.constant 0 : i32
    %c0_i32_0 = arith.constant 0 : i32
    return %c0_i32, %arg1 : i32, i32
  }
  func.func @transform_4(%arg0: i32, %arg1: i32) -> (i32, i32) {
    %c0_i32 = arith.constant 0 : i32
    return %arg0, %arg1 : i32, i32
  }
}

</mosaic_0001>

<bundles_post_ra>
// kernel: tpu_custom_call.1
= control target key start
LH: loop header
LB: loop body
LE: loop exit
PB: predicated region body
PF: predicated region fallthrough
CT: control target
= control target key end

     0   :  { %9 = vsyncpa [#allocation3], 0  ;;  %s2895_s0 = inlined_call_operand.vmem [shape: bf16[2048,147], index: 0, kind: input, shape index: {}]   ;;  %s2896_s1 = inlined_call_operand.vmem [shape: bf16[147,128], index: 1, kind: input, shape index: {}]   ;;  %s2897_s2 = inlined_call_operand.vmem [shape: f32[1,128], index: 2, kind: input, shape index: {}]   ;;  %s2898_s3 = inlined_call_operand.vmem [shape: f32[1,128], index: 3, kind: input, shape index: {}]   ;;  %s2899_s4 = inlined_call_operand.hbm [shape: bf16[2048,128], index: 4, kind: output, shape index: {}]  }
   0x1   :  { %11 = vsyncpa [#allocation3 + $0x1], 0  ;;  %s2476_s15 = smov 0   ;;  %s2478_s16 = smov 0  }
   0x2   :  { %s2480_s17 = smov 0   ;;  %s2482_s18 = smov 0  }
   0x3   :  { %s2484_s19 = smov 0   ;;  %s2486_s20 = smov 0  }
   0x4 LB: > { %s1735_s21 = sadd.s32 4294967295, %s2444_s20   ;;  %s1736_s22 = sadd.s32 4294967294, %s2444_s20   ;;  %s2444_s20 = sphi %s2486_s20, %s17_s20   ;;  %s2440_s19 = sphi %s2484_s19, %s2906_s19   ;;  %s2436_s18 = sphi %s2482_s18, %s2905_s18   ;;  %s2432_s17 = sphi %s2480_s17, %s2904_s17   ;;  %s2428_s16 = sphi %s2478_s16, %s2903_s16   ;;  %s2424_s15 = sphi %s2476_s15, %s2902_s15  }
   0x5   : > { %s29_s23 = sadd.s32 1, %s2440_s19  ;;  %s142_s24 = sadd.s32 1, %s2432_s17 }
   0x6   : > { %p31_p0 = scmp.ge.s32.totalorder %s29_s23, 4  ;;  %p152_p1 = scmp.ne.s32.totalorder %s2432_s17, %s2428_s16 }
   0x7   : > { %p153_p2 = scmp.eq.s32.totalorder %s1735_s21, 3  ;;  %p158_p3 = scmp.ne.s32.totalorder %s2428_s16, %s2424_s15 }
   0x8   : > { %s2908_s23 = smov (%p31_p0, %s29_s23), 0  ;;  %p159_p5 = scmp.eq.s32.totalorder %s1736_s22, 3 }
   0x9   : > { %p2516_p4 = por %p153_p2, %p152_p1  ;;  %s137_s26 = ssub.s32 %s2440_s19, %s2908_s23 }
   0xa   : > { %p1742_p6 = scmp.ge.s32.totalorder %s2444_s20, 1  ;;  %p140_p7 = scmp.eq.s32.totalorder %s137_s26, 0 }
   0xb   : > { %p2523_p8 = por %p159_p5, %p158_p3  ;;  %p206_p9 = scmp.lt.s32.totalorder %s2444_s20, 5 }
   0xc   : > { %s2529_s28 = scalar_select %p140_p7, %s2432_s17, %s142_s24  }
   0xd   : > { %p207_p10 = pnand %p1742_p6, %p206_p9 }
   0xe   : > { %v2260_v0 = vld [vmem:[%s2896_s1] sm:$0xff] (!%p207_p10)   ;;  %v2446_v1 = vmov (!%p207_p10), 0   ;;  %v2261_v2 = vld [vmem:[%s2896_s1 + $0x8] sm:$0xff] (!%p207_p10)   ;;  %v2262_v3 = vld [vmem:[%s2896_s1 + $0x10] sm:$0xff] (!%p207_p10)   ;;  %s1744_s9 = sshll.u32 (!%p207_p10), %s2436_s18, 6  ;;  %vm690_vm0 = vcmask (!%p207_p10), 154624  }
   0xf   : > { %210 = sbr.rel (%p207_p10) target bundleno = 413 (0x19d), region = 36  ;;  %794 = vmatprep.subr.bf16.mxu0 (!%p207_p10), %v2446_v1  ;;  %2181 = vmatprep.subr.bf16.mxu1 (!%p207_p10), %v2446_v1  ;;  %p244_p11 = scmp.lt.s32.totalorder (!%p207_p10), %s1744_s9, 255  ;;  %v2263_v4 = vld [vmem:[%s2896_s1 + $0x18] sm:$0xff] (!%p207_p10)   ;;  %v2264_v5 = vld [vmem:[%s2896_s1 + $0x20] sm:$0xff] (!%p207_p10)   ;;  %v2265_v8 = vld [vmem:[%s2896_s1 + $0x28] sm:$0xff] (!%p207_p10)   ;;  %vm787_vm1 = vcmask (!%p207_p10), 1040384  }
  0x10   : > { %795 = vmatpush1.bf16.msra.mxu0 (!%p207_p10), %v2260_v0  ;;  %2191 = vmatpush1.bf16.msra.mxu1 (!%p207_p10), %v2260_v0  ;;  %v2266_v9 = vld [vmem:[%s2896_s1 + $0x30] sm:$0xff] (!%p207_p10)   ;;  %v2267_v10 = vld [vmem:[%s2896_s1 + $0x38] sm:$0xff] (!%p207_p10)   ;;  %vm788_vm2 = vcmask (!%p207_p10), 1041408   ;;  %v2447_v11 = vmov (!%p207_p10), 65535   ;;  %v2268_v13 = vld [vmem:[%s2896_s1 + $0x40] sm:$0xff] (!%p207_p10)   ;;  %s1989_s29 = sshll.u32 (!%p207_p10), %s2436_s18, 12 }
  0x11   : > { %796 = vmatprep.subr.bf16.mxu0 (!%p207_p10), %v2446_v1  ;;  %2182 = vmatprep.subr.bf16.mxu1 (!%p207_p10), %v2446_v1  ;;  %v789_v12 = vsel (!%p207_p10), %vm787_vm1, 4294967295, %v2447_v11  ;;  %v2269_v14 = vld [vmem:[%s2896_s1 + $0x48] ss:$0 sps:$4 sm:$0x33] (!%p207_p10)   ;;  %s2841_s7 = scalar_lea.hbm (!%p207_p10), %s2899_s4, %s1989_s29 }
  0x12   : > { %v790_v15 = vsel (!%p207_p10), %vm788_vm2, %v789_v12, 0 }
  0x13   : > { %v792_v16 = vand.u32 (!%p207_p10), %v2269_v14, %v790_v15  ;;  %v2666_v15 = vld [vmem:[%s2897_s2] ss:$0 sm:$0xff] (!%p207_p10) }
  0x14   : > { %797 = vmatpush1.bf16.msra.mxu0 (!%p207_p10), %v2261_v2  ;;  %2192 = vmatpush1.bf16.msra.mxu1 (!%p207_p10), %v2261_v2 }
  0x15   : > { %798 = vmatprep.subr.bf16.mxu0 (!%p207_p10), %v2446_v1  ;;  %2183 = vmatprep.subr.bf16.mxu1 (!%p207_p10), %v2446_v1 }
  0x16   : > { %s2910_s9 = smov (!%p244_p11, %s1744_s9), 255 }
  0x17   : > { %s1924_s12 = sshll.u32 %s2910_s9, 3  ;;  %s2448_s9 = smov [#allocation2]  }
  0x18   : > { %799 = vmatpush1.bf16.msra.mxu0 %v2262_v3  ;;  %2193 = vmatpush1.bf16.msra.mxu1 %v2262_v3  ;;  %s2547_s21 = scalar_lea.vmem %s2895_s0, %s1924_s12  ;;  %s2370_s10 = sshll.u32 %s2448_s9, 4  ;;  %s2371_s10 = int_to_ptr.vmem [resolvable:$false] %s2370_s10 }
  0x19   : > { %800 = vmatprep.subr.bf16.mxu0 %v2446_v1  ;;  %2184 = vmatprep.subr.bf16.mxu1 %v2446_v1  ;;  %v2272_v6 = vld [vmem:[%s2547_s21 + $0x4] ss:$8 sps:$4 sm:$0xff]   ;;  %v2270_v17 = vld [vmem:[%s2547_s21] ss:$8 sps:$4 sm:$0xff]   ;;  %v2276_v19 = vld [vmem:[%s2547_s21 + $0x14] ss:$8 sps:$4 sm:$0xff]  }
  0x1a   : > { %v2275_v7 = vld [vmem:[%s2547_s21 + $0x104] ss:$8 sps:$4 sm:$0xff]   ;;  %1821 = vmatprep.mubr.msk.bf16.mxu0 %vm690_vm0, %v2272_v6  ;;  %v2273_v18 = vld [vmem:[%s2547_s21 + $0x100] ss:$8 sps:$4 sm:$0xff]   ;;  %v2278_v20 = vld [vmem:[%s2547_s21 + $0x114] ss:$8 sps:$4 sm:$0xff]  }
  0x1b   : > { %1837 = vmatprep.mubr.msk.bf16.mxu1 %vm690_vm0, %v2275_v7  ;;  %v2280_v21 = vld [vmem:[%s2547_s21 + $0x10] ss:$8 sps:$4 sm:$0xff]   ;;  %v2282_v23 = vld [vmem:[%s2547_s21 + $0x24] ss:$8 sps:$4 sm:$0xff]   ;;  %v2286_v25 = vld [vmem:[%s2547_s21 + $0x20] ss:$8 sps:$4 sm:$0xff]  }
  0x1c   : > { %801 = vmatpush1.bf16.msra.mxu0 %v2263_v4  ;;  %2194 = vmatpush1.bf16.msra.mxu1 %v2263_v4  ;;  %v2281_v22 = vld [vmem:[%s2547_s21 + $0x110] ss:$8 sps:$4 sm:$0xff]   ;;  %v2284_v24 = vld [vmem:[%s2547_s21 + $0x124] ss:$8 sps:$4 sm:$0xff]   ;;  %v2287_v26 = vld [vmem:[%s2547_s21 + $0x120] ss:$8 sps:$4 sm:$0xff]  }
  0x1d   : > { %802 = vmatprep.subr.bf16.mxu0 %v2446_v1  ;;  %2185 = vmatprep.subr.bf16.mxu1 %v2446_v1  ;;  %v2288_v27 = vld [vmem:[%s2547_s21 + $0x34] ss:$8 sps:$4 sm:$0xff]   ;;  %v2292_v29 = vld [vmem:[%s2547_s21 + $0x30] ss:$8 sps:$4 sm:$0xff]   ;;  %v2294_v31 = vld [vmem:[%s2547_s21 + $0x44] ss:$8 sps:$4 sm:$0xff]  }
  0x1e   : > { %v2290_v28 = vld [vmem:[%s2547_s21 + $0x134] ss:$8 sps:$4 sm:$0xff]   ;;  %v2293_v30 = vld [vmem:[%s2547_s21 + $0x130] ss:$8 sps:$4 sm:$0xff]   ;;  %v2296_v32 = vld [vmem:[%s2547_s21 + $0x144] ss:$8 sps:$4 sm:$0xff]  }
  0x1f   : > { %v2298_v33 = vld [vmem:[%s2547_s21 + $0x40] ss:$8 sps:$4 sm:$0xff]   ;;  %v2300_v35 = vld [vmem:[%s2547_s21 + $0x54] ss:$8 sps:$4 sm:$0xff]   ;;  %v2304_v37 = vld [vmem:[%s2547_s21 + $0x50] ss:$8 sps:$4 sm:$0xff]  }
  0x20   : > { %803 = vmatpush1.bf16.msra.mxu0 %v2264_v5  ;;  %2195 = vmatpush1.bf16.msra.mxu1 %v2264_v5  ;;  %v2299_v34 = vld [vmem:[%s2547_s21 + $0x140] ss:$8 sps:$4 sm:$0xff]   ;;  %v2302_v36 = vld [vmem:[%s2547_s21 + $0x154] ss:$8 sps:$4 sm:$0xff]   ;;  %v2305_v38 = vld [vmem:[%s2547_s21 + $0x150] ss:$8 sps:$4 sm:$0xff]  }
  0x21   : > { %804 = vmatprep.subr.bf16.mxu0 %v2446_v1  ;;  %2186 = vmatprep.subr.bf16.mxu1 %v2446_v1  ;;  %v2306_v39 = vld [vmem:[%s2547_s21 + $0x64] ss:$8 sps:$4 sm:$0xff]   ;;  %v2310_v41 = vld [vmem:[%s2547_s21 + $0x60] ss:$8 sps:$4 sm:$0xff]   ;;  %v2312_v43 = vld [vmem:[%s2547_s21 + $0x74] ss:$8 sps:$4 sm:$0xff]  }
  0x22   : > { %v2308_v40 = vld [vmem:[%s2547_s21 + $0x164] ss:$8 sps:$4 sm:$0xff]   ;;  %v2311_v42 = vld [vmem:[%s2547_s21 + $0x160] ss:$8 sps:$4 sm:$0xff]   ;;  %v2314_v44 = vld [vmem:[%s2547_s21 + $0x174] ss:$8 sps:$4 sm:$0xff]  }
  0x23   : > { %v2316_v45 = vld [vmem:[%s2547_s21 + $0x70] ss:$8 sps:$4 sm:$0xff]   ;;  %v2318_v47 = vld [vmem:[%s2547_s21 + $0x84] ss:$8 sps:$4 sm:$0xff]   ;;  %v2322_v49 = vld [vmem:[%s2547_s21 + $0x80] ss:$8 sps:$4 sm:$0xff]  }
  0x24   : > { %805 = vmatpush1.bf16.msra.mxu0 %v2265_v8  ;;  %2196 = vmatpush1.bf16.msra.mxu1 %v2265_v8  ;;  %v2317_v46 = vld [vmem:[%s2547_s21 + $0x170] ss:$8 sps:$4 sm:$0xff]   ;;  %v2320_v48 = vld [vmem:[%s2547_s21 + $0x184] ss:$8 sps:$4 sm:$0xff]   ;;  %v2323_v50 = vld [vmem:[%s2547_s21 + $0x180] ss:$8 sps:$4 sm:$0xff]  }
  0x25   : > { %806 = vmatprep.subr.bf16.mxu0 %v2446_v1  ;;  %2187 = vmatprep.subr.bf16.mxu1 %v2446_v1  ;;  %v2324_v51 = vld [vmem:[%s2547_s21 + $0x94] ss:$8 sps:$4 sm:$0xff]   ;;  %v2328_v53 = vld [vmem:[%s2547_s21 + $0x90] ss:$8 sps:$4 sm:$0xff]   ;;  %v2330_v55 = vld [vmem:[%s2547_s21 + $0xa4] ss:$8 sps:$4 sm:$0xff]  }
  0x26   : > { %v2326_v52 = vld [vmem:[%s2547_s21 + $0x194] ss:$8 sps:$4 sm:$0xff]   ;;  %v2329_v54 = vld [vmem:[%s2547_s21 + $0x190] ss:$8 sps:$4 sm:$0xff]   ;;  %v2332_v56 = vld [vmem:[%s2547_s21 + $0x1a4] ss:$8 sps:$4 sm:$0xff]  }
  0x27   : > { %v2334_v57 = vld [vmem:[%s2547_s21 + $0xa0] ss:$8 sps:$4 sm:$0xff]   ;;  %v2336_v59 = vld [vmem:[%s2547_s21 + $0xb4] ss:$8 sps:$4 sm:$0xff]   ;;  %v2340_v61 = vld [vmem:[%s2547_s21 + $0xb0] ss:$8 sps:$4 sm:$0xff]  }
  0x28   : > { %807 = vmatpush1.bf16.msra.mxu0 %v2266_v9  ;;  %2197 = vmatpush1.bf16.msra.mxu1 %v2266_v9  ;;  %v2335_v58 = vld [vmem:[%s2547_s21 + $0x1a0] ss:$8 sps:$4 sm:$0xff]   ;;  %v2338_v60 = vld [vmem:[%s2547_s21 + $0x1b4] ss:$8 sps:$4 sm:$0xff]   ;;  %v2341_v62 = vld [vmem:[%s2547_s21 + $0x1b0] ss:$8 sps:$4 sm:$0xff]  }
  0x29   : > { %808 = vmatprep.subr.bf16.mxu0 %v2446_v1  ;;  %2188 = vmatprep.subr.bf16.mxu1 %v2446_v1  ;;  %v2342_v63 = vld [vmem:[%s2547_s21 + $0xc4] ss:$8 sps:$4 sm:$0xff]   ;;  %v2347_v2 = vld [vmem:[%s2547_s21 + $0x1c0] ss:$8 sps:$4 sm:$0xff]   ;;  %v2348_v3 = vld [vmem:[%s2547_s21 + $0xd4] ss:$8 sps:$4 sm:$0xff]  }
  0x2a   : > { %v2344_v0 = vld [vmem:[%s2547_s21 + $0x1c4] ss:$8 sps:$4 sm:$0xff]   ;;  %v2350_v4 = vld [vmem:[%s2547_s21 + $0x1d4] ss:$8 sps:$4 sm:$0xff]   ;;  %v2352_v5 = vld [vmem:[%s2547_s21 + $0xd0] ss:$8 sps:$4 sm:$0xff]  }
  0x2b   : > { %v2353_v6 = vld [vmem:[%s2547_s21 + $0x1d0] ss:$8 sps:$4 sm:$0xff]   ;;  %v2354_v7 = vld [vmem:[%s2547_s21 + $0xe4] ss:$8 sps:$4 sm:$0xff]   ;;  %v2358_v9 = vld [vmem:[%s2547_s21 + $0xe0] ss:$8 sps:$4 sm:$0xff]  }
  0x2c   : > { %809 = vmatpush1.bf16.msra.mxu0 %v2267_v10  ;;  %2198 = vmatpush1.bf16.msra.mxu1 %v2267_v10  ;;  %v2356_v8 = vld [vmem:[%s2547_s21 + $0x1e4] ss:$8 sps:$4 sm:$0xff]   ;;  %v2359_v10 = vld [vmem:[%s2547_s21 + $0x1e0] ss:$8 sps:$4 sm:$0xff]   ;;  %v2360_v11 = vld [vmem:[%s2547_s21 + $0xf4] ss:$8 sps:$4 sm:$0xff]  }
  0x2d   : > { %810 = vmatprep.subr.bf16.mxu0 %v2446_v1  ;;  %2189 = vmatprep.subr.bf16.mxu1 %v2446_v1  ;;  %v2362_v12 = vld [vmem:[%s2547_s21 + $0x1f4] ss:$8 sps:$4 sm:$0xff]   ;;  %v2365_v14 = vld [vmem:[%s2547_s21 + $0x1f0] ss:$8 sps:$4 sm:$0xff]   ;;  %s2372_s11 = scalar_lea.vmem %s2371_s10, 8192 }
  0x30   : > { %811 = vmatpush1.bf16.msra.mxu0 %v2268_v13  ;;  %2199 = vmatpush1.bf16.msra.mxu1 %v2268_v13  ;;  %v2364_v13 = vld [vmem:[%s2547_s21 + $0xf0] ss:$8 sps:$4 sm:$0xff]  }
  0x31   : > { %812 = vmatprep.subr.bf16.mxu0 %v2446_v1  ;;  %2190 = vmatprep.subr.bf16.mxu1 %v2446_v1  ;;  %v2346_v1 = vld [vmem:[%s2547_s21 + $0xc0] ss:$8 sps:$4 sm:$0xff]   ;;  %s240_s21 = sand.u32 1, %s2428_s16  }
  0x32   : > { %s1743_s24 = sshll.u32 %s240_s21, 8  ;;  %s2849_s18 = scalar_lea.sflag [#allocation3], %s240_s21 }
  0x33   : > { %s2686_s26 = scalar_lea.vmem [#allocation2], %s1743_s24 }
  0x34   : > { %813 = vmatpush1.bf16.msra.mxu0 %v792_v16  ;;  %2200 = vmatpush1.bf16.msra.mxu1 %v792_v16  ;;  %s1624_s30 = sshll.u32 %s2686_s26, 4  ;;  %s2843_s30 = int_to_ptr.vmem [resolvable:$true] %s1624_s30 }
  0x35   : > { %s2366_s8 = scalar_lea.vmem %s2843_s30, 4096  ;;  %p2373_p1 = scmp.lt.s32.totalorder %s2843_s30, %s2371_s10 }
  0x36   : > { %p2367_p12 = scmp.ne.s32.totalorder %s2843_s30, %s2366_s8  ;;  %p2374_p2 = scmp.lt.s32.totalorder %s2372_s11, %s2366_s8 }
  0x37   : > { %827 = vmatmul.mubr.bf16.vlgmr.msra.gmra.mrb[0].mxu0 %v2270_v17  ;;  %955 = vmatmul.mubr.bf16.vlgmr.msra.gmra.mrb[0].mxu1 %v2273_v18  ;;  %v2671_v17 = vld [vmem:[%s2898_s3] ss:$0 sm:$0xff] }
  0x38   : > { %1822 = vmatprep.mubr.msk.bf16.mxu0 %vm690_vm0, %v2276_v19  ;;  %1838 = vmatprep.mubr.msk.bf16.mxu1 %vm690_vm0, %v2278_v20  ;;  %p2368_p13 = pnand %p2367_p12, %p2516_p4  ;;  %p2375_p3 = por %p2374_p2, %p2373_p1 }
  0x3a   : > { %p2369_p0 = pneg %p2368_p13 }
  0x3c   : > { %p2376_p5 = pnand %p2375_p3, %p2369_p0 }
  0x3f   : > { %835 = vmatmul.mubr.bf16.gmra.mrb[4].mxu0 %v2280_v21  ;;  %963 = vmatmul.mubr.bf16.gmra.mrb[4].mxu1 %v2281_v22 }
  0x40   : > { %1823 = vmatprep.mubr.msk.bf16.mxu0 %vm690_vm0, %v2282_v23  ;;  %1839 = vmatprep.mubr.msk.bf16.mxu1 %vm690_vm0, %v2284_v24 }
  0x47   : > { %843 = vmatmul.mubr.bf16.gmra.mrb[8].mxu0 %v2286_v25  ;;  %971 = vmatmul.mubr.bf16.gmra.mrb[8].mxu1 %v2287_v26 }
  0x48   : > { %1824 = vmatprep.mubr.msk.bf16.mxu0 %vm690_vm0, %v2288_v27  ;;  %1840 = vmatprep.mubr.msk.bf16.mxu1 %vm690_vm0, %v2290_v28 }
  0x4f   : > { %851 = vmatmul.mubr.bf16.gmra.mrb[12].mxu0 %v2292_v29  ;;  %979 = vmatmul.mubr.bf16.gmra.mrb[12].mxu1 %v2293_v30 }
  0x50   : > { %1825 = vmatprep.mubr.msk.bf16.mxu0 %vm690_vm0, %v2294_v31  ;;  %1841 = vmatprep.mubr.msk.bf16.mxu1 %vm690_vm0, %v2296_v32 }
  0x57   : > { %859 = vmatmul.mubr.bf16.gmra.mrb[16].mxu0 %v2298_v33  ;;  %987 = vmatmul.mubr.bf16.gmra.mrb[16].mxu1 %v2299_v34 }
  0x58   : > { %1826 = vmatprep.mubr.msk.bf16.mxu0 %vm690_vm0, %v2300_v35  ;;  %1842 = vmatprep.mubr.msk.bf16.mxu1 %vm690_vm0, %v2302_v36 }
  0x5f   : > { %867 = vmatmul.mubr.bf16.gmra.mrb[20].mxu0 %v2304_v37  ;;  %995 = vmatmul.mubr.bf16.gmra.mrb[20].mxu1 %v2305_v38 }
  0x60   : > { %1827 = vmatprep.mubr.msk.bf16.mxu0 %vm690_vm0, %v2306_v39  ;;  %1843 = vmatprep.mubr.msk.bf16.mxu1 %vm690_vm0, %v2308_v40 }
  0x67   : > { %875 = vmatmul.mubr.bf16.gmra.mrb[24].mxu0 %v2310_v41  ;;  %1003 = vmatmul.mubr.bf16.gmra.mrb[24].mxu1 %v2311_v42 }
  0x68   : > { %1828 = vmatprep.mubr.msk.bf16.mxu0 %vm690_vm0, %v2312_v43  ;;  %1844 = vmatprep.mubr.msk.bf16.mxu1 %vm690_vm0, %v2314_v44 }
  0x6f   : > { %883 = vmatmul.mubr.bf16.gmra.mrb[28].mxu0 %v2316_v45  ;;  %1011 = vmatmul.mubr.bf16.gmra.mrb[28].mxu1 %v2317_v46 }
  0x70   : > { %1829 = vmatprep.mubr.msk.bf16.mxu0 %vm690_vm0, %v2318_v47  ;;  %1845 = vmatprep.mubr.msk.bf16.mxu1 %vm690_vm0, %v2320_v48 }
  0x77   : > { %891 = vmatmul.mubr.bf16.gmra.mrb[32].mxu0 %v2322_v49  ;;  %1019 = vmatmul.mubr.bf16.gmra.mrb[32].mxu1 %v2323_v50 }
  0x78   : > { %1830 = vmatprep.mubr.msk.bf16.mxu0 %vm690_vm0, %v2324_v51  ;;  %1846 = vmatprep.mubr.msk.bf16.mxu1 %vm690_vm0, %v2326_v52 }
  0x7f   : > { %899 = vmatmul.mubr.bf16.gmra.mrb[36].mxu0 %v2328_v53  ;;  %1027 = vmatmul.mubr.bf16.gmra.mrb[36].mxu1 %v2329_v54 }
  0x80   : > { %1831 = vmatprep.mubr.msk.bf16.mxu0 %vm690_vm0, %v2330_v55  ;;  %1847 = vmatprep.mubr.msk.bf16.mxu1 %vm690_vm0, %v2332_v56 }
  0x87   : > { %907 = vmatmul.mubr.bf16.gmra.mrb[40].mxu0 %v2334_v57  ;;  %1035 = vmatmul.mubr.bf16.gmra.mrb[40].mxu1 %v2335_v58 }
  0x88   : > { %1832 = vmatprep.mubr.msk.bf16.mxu0 %vm690_vm0, %v2336_v59  ;;  %1848 = vmatprep.mubr.msk.bf16.mxu1 %vm690_vm0, %v2338_v60 }
  0x8f   : > { %915 = vmatmul.mubr.bf16.gmra.mrb[44].mxu0 %v2340_v61  ;;  %1043 = vmatmul.mubr.bf16.gmra.mrb[44].mxu1 %v2341_v62 }
  0x90   : > { %1833 = vmatprep.mubr.msk.bf16.mxu0 %vm690_vm0, %v2342_v63  ;;  %1849 = vmatprep.mubr.msk.bf16.mxu1 %vm690_vm0, %v2344_v0 }
  0x97   : > { %923 = vmatmul.mubr.bf16.gmra.mrb[48].mxu0 %v2346_v1  ;;  %1051 = vmatmul.mubr.bf16.gmra.mrb[48].mxu1 %v2347_v2 }
  0x98   : > { %1834 = vmatprep.mubr.msk.bf16.mxu0 %vm690_vm0, %v2348_v3  ;;  %1850 = vmatprep.mubr.msk.bf16.mxu1 %vm690_vm0, %v2350_v4 }
  0x9f   : > { %931 = vmatmul.mubr.bf16.gmra.mrb[52].mxu0 %v2352_v5  ;;  %1059 = vmatmul.mubr.bf16.gmra.mrb[52].mxu1 %v2353_v6 }
  0xa0   : > { %1835 = vmatprep.mubr.msk.bf16.mxu0 %vm690_vm0, %v2354_v7  ;;  %1851 = vmatprep.mubr.msk.bf16.mxu1 %vm690_vm0, %v2356_v8 }
  0xa7   : > { %939 = vmatmul.mubr.bf16.gmra.mrb[56].mxu0 %v2358_v9  ;;  %1067 = vmatmul.mubr.bf16.gmra.mrb[56].mxu1 %v2359_v10 }
  0xa8   : > { %1836 = vmatprep.mubr.msk.bf16.mxu0 %vm690_vm0, %v2360_v11  ;;  %1852 = vmatprep.mubr.msk.bf16.mxu1 %vm690_vm0, %v2362_v12 }
  0xaf   : > { %947 = vmatmul.mubr.bf16.gmra.mrb[60].mxu0 %v2364_v13  ;;  %1075 = vmatmul.mubr.bf16.gmra.mrb[60].mxu1 %v2365_v14 }
 0x10a   : > { %v828_v16 = vpop.f32.mrb[0].mxu0  ;;  %v956_v18 = vpop.f32.mrb[0].mxu1 }
 0x10b   : > { %v1090_v19 = vmul.f32 %v2666_v15, %v828_v16  ;;  %v1122_v20 = vmul.f32 %v2666_v15, %v956_v18  ;;  %v830_v21 = vpop.f32.mrb[1].mxu0  ;;  %v958_v22 = vpop.f32.mrb[1].mxu1 }
 0x10c   : > { %v831_v23 = vpop.f32.mrb[2].mxu0  ;;  %v959_v24 = vpop.f32.mrb[2].mxu1 }
 0x10d   : > { %v1161_v25 = vadd.f32 %v2671_v17, %v1090_v19  ;;  %v1193_v26 = vadd.f32 %v2671_v17, %v1122_v20  ;;  %v1091_v27 = vmul.f32 %v2666_v15, %v831_v23  ;;  %v1123_v28 = vmul.f32 %v2666_v15, %v959_v24  ;;  %v833_v29 = vpop.f32.mrb[3].mxu0  ;;  %v961_v30 = vpop.f32.mrb[3].mxu1 }
 0x10f   : > { %v1162_v31 = vadd.f32 %v2671_v17, %v1091_v27  ;;  %v1194_v32 = vadd.f32 %v2671_v17, %v1123_v28  ;;  %v1225_v33 = vmax.f32 %v1161_v25, 0.0  ;;  %v1257_v34 = vmax.f32 %v1193_v26, 0.0 }
 0x111   : > { %v1226_v35 = vmax.f32 %v1162_v31, 0.0  ;;  %v1258_v36 = vmax.f32 %v1194_v32, 0.0 }
 0x112   : > { %v836_v37 = vpop.f32.mrb[4].mxu0  ;;  %v964_v38 = vpop.f32.mrb[4].mxu1 }
 0x113   : > { %v1993_v39 = vpack.c.bf16 %v1226_v35, %v1225_v33  ;;  %v2073_v40 = vpack.c.bf16 %v1258_v36, %v1257_v34  ;;  %v1092_v41 = vmul.f32 %v2666_v15, %v836_v37  ;;  %v1124_v42 = vmul.f32 %v2666_v15, %v964_v38  ;;  %v838_v43 = vpop.f32.mrb[5].mxu0  ;;  %v966_v44 = vpop.f32.mrb[5].mxu1 }
 0x114   : > { %v839_v45 = vpop.f32.mrb[6].mxu0  ;;  %v967_v46 = vpop.f32.mrb[6].mxu1 }
 0x115   : > { %1994 = vst [vmem:[%s2686_s26] sm:$0xff] %v1993_v39   ;;  %2165 = vst [vmem:[%s2686_s26 + $0x80] sm:$0xff] %v2073_v40   ;;  %v1163_v47 = vadd.f32 %v2671_v17, %v1092_v41  ;;  %v1195_v48 = vadd.f32 %v2671_v17, %v1124_v42  ;;  %v1093_v49 = vmul.f32 %v2666_v15, %v839_v45  ;;  %v841_v51 = vpop.f32.mrb[7].mxu0  ;;  %v969_v52 = vpop.f32.mrb[7].mxu1 }
 0x116   : > { %v1125_v50 = vmul.f32 %v2666_v15, %v967_v46 }
 0x117   : > { %v1164_v53 = vadd.f32 %v2671_v17, %v1093_v49  ;;  %v1227_v55 = vmax.f32 %v1163_v47, 0.0  ;;  %v1259_v56 = vmax.f32 %v1195_v48, 0.0 }
 0x118   : > { %v1196_v54 = vadd.f32 %v2671_v17, %v1125_v50 }
 0x119   : > { %v1228_v57 = vmax.f32 %v1164_v53, 0.0 }
 0x11a   : > { %v1260_v58 = vmax.f32 %v1196_v54, 0.0  ;;  %v844_v59 = vpop.f32.mrb[8].mxu0  ;;  %v972_v60 = vpop.f32.mrb[8].mxu1 }
 0x11b   : > { %v1998_v61 = vpack.c.bf16 %v1228_v57, %v1227_v55  ;;  %v1094_v63 = vmul.f32 %v2666_v15, %v844_v59  ;;  %v1126_v0 = vmul.f32 %v2666_v15, %v972_v60  ;;  %v846_v1 = vpop.f32.mrb[9].mxu0  ;;  %v974_v2 = vpop.f32.mrb[9].mxu1 }
 0x11c   : > { %v2078_v62 = vpack.c.bf16 %v1260_v58, %v1259_v56  ;;  %v847_v3 = vpop.f32.mrb[10].mxu0  ;;  %v975_v4 = vpop.f32.mrb[10].mxu1 }
 0x11d   : > { %2150 = vst [vmem:[%s2686_s26 + $0x8] sm:$0xff] %v1998_v61   ;;  %v1165_v5 = vadd.f32 %v2671_v17, %v1094_v63  ;;  %v1197_v6 = vadd.f32 %v2671_v17, %v1126_v0  ;;  %v1095_v7 = vmul.f32 %v2666_v15, %v847_v3  ;;  %v1127_v8 = vmul.f32 %v2666_v15, %v975_v4  ;;  %v849_v9 = vpop.f32.mrb[11].mxu0  ;;  %v977_v10 = vpop.f32.mrb[11].mxu1 }
 0x11e   : > { %2166 = vst [vmem:[%s2686_s26 + $0x88] sm:$0xff] %v2078_v62  }
 0x11f   : > { %v1166_v11 = vadd.f32 %v2671_v17, %v1095_v7  ;;  %v1198_v12 = vadd.f32 %v2671_v17, %v1127_v8  ;;  %v1229_v13 = vmax.f32 %v1165_v5, 0.0  ;;  %v1261_v14 = vmax.f32 %v1197_v6, 0.0 }
 0x121   : > { %v1230_v16 = vmax.f32 %v1166_v11, 0.0  ;;  %v1262_v18 = vmax.f32 %v1198_v12, 0.0 }
 0x122   : > { %v852_v19 = vpop.f32.mrb[12].mxu0  ;;  %v980_v20 = vpop.f32.mrb[12].mxu1 }
 0x123   : > { %v2003_v21 = vpack.c.bf16 %v1230_v16, %v1229_v13  ;;  %v2083_v22 = vpack.c.bf16 %v1262_v18, %v1261_v14  ;;  %v1096_v23 = vmul.f32 %v2666_v15, %v852_v19  ;;  %v1128_v24 = vmul.f32 %v2666_v15, %v980_v20  ;;  %v854_v25 = vpop.f32.mrb[13].mxu0  ;;  %v982_v26 = vpop.f32.mrb[13].mxu1 }
 0x124   : > { %v855_v27 = vpop.f32.mrb[14].mxu0  ;;  %v983_v28 = vpop.f32.mrb[14].mxu1 }
 0x125   : > { %2151 = vst [vmem:[%s2686_s26 + $0x10] sm:$0xff] %v2003_v21   ;;  %2167 = vst [vmem:[%s2686_s26 + $0x90] sm:$0xff] %v2083_v22   ;;  %v1167_v29 = vadd.f32 %v2671_v17, %v1096_v23  ;;  %v1199_v30 = vadd.f32 %v2671_v17, %v1128_v24  ;;  %v1097_v31 = vmul.f32 %v2666_v15, %v855_v27  ;;  %v857_v33 = vpop.f32.mrb[15].mxu0  ;;  %v985_v34 = vpop.f32.mrb[15].mxu1 }
 0x126   : > { %v1129_v32 = vmul.f32 %v2666_v15, %v983_v28 }
 0x127   : > { %v1168_v35 = vadd.f32 %v2671_v17, %v1097_v31  ;;  %v1231_v37 = vmax.f32 %v1167_v29, 0.0  ;;  %v1263_v38 = vmax.f32 %v1199_v30, 0.0 }
 0x128   : > { %v1200_v36 = vadd.f32 %v2671_v17, %v1129_v32 }
 0x129   : > { %v1232_v39 = vmax.f32 %v1168_v35, 0.0 }
 0x12a   : > { %v1264_v40 = vmax.f32 %v1200_v36, 0.0  ;;  %v860_v41 = vpop.f32.mrb[16].mxu0  ;;  %v988_v42 = vpop.f32.mrb[16].mxu1 }
 0x12b   : > { %v2008_v43 = vpack.c.bf16 %v1232_v39, %v1231_v37  ;;  %v1098_v45 = vmul.f32 %v2666_v15, %v860_v41  ;;  %v1130_v46 = vmul.f32 %v2666_v15, %v988_v42  ;;  %v862_v47 = vpop.f32.mrb[17].mxu0  ;;  %v990_v48 = vpop.f32.mrb[17].mxu1 }
 0x12c   : > { %v2088_v44 = vpack.c.bf16 %v1264_v40, %v1263_v38  ;;  %v863_v49 = vpop.f32.mrb[18].mxu0  ;;  %v991_v50 = vpop.f32.mrb[18].mxu1 }
 0x12d   : > { %2152 = vst [vmem:[%s2686_s26 + $0x18] sm:$0xff] %v2008_v43   ;;  %v1169_v51 = vadd.f32 %v2671_v17, %v1098_v45  ;;  %v1201_v52 = vadd.f32 %v2671_v17, %v1130_v46  ;;  %v1099_v53 = vmul.f32 %v2666_v15, %v863_v49  ;;  %v1131_v54 = vmul.f32 %v2666_v15, %v991_v50  ;;  %v865_v55 = vpop.f32.mrb[19].mxu0  ;;  %v993_v56 = vpop.f32.mrb[19].mxu1 }
 0x12e   : > { %2168 = vst [vmem:[%s2686_s26 + $0x98] sm:$0xff] %v2088_v44  }
 0x12f   : > { %v1170_v57 = vadd.f32 %v2671_v17, %v1099_v53  ;;  %v1202_v58 = vadd.f32 %v2671_v17, %v1131_v54  ;;  %v1233_v59 = vmax.f32 %v1169_v51, 0.0  ;;  %v1265_v60 = vmax.f32 %v1201_v52, 0.0 }
 0x131   : > { %v1234_v61 = vmax.f32 %v1170_v57, 0.0  ;;  %v1266_v62 = vmax.f32 %v1202_v58, 0.0 }
 0x132   : > { %v868_v63 = vpop.f32.mrb[20].mxu0  ;;  %v996_v0 = vpop.f32.mrb[20].mxu1 }
 0x133   : > { %v2013_v1 = vpack.c.bf16 %v1234_v61, %v1233_v59  ;;  %v2093_v2 = vpack.c.bf16 %v1266_v62, %v1265_v60  ;;  %v1100_v3 = vmul.f32 %v2666_v15, %v868_v63  ;;  %v1132_v4 = vmul.f32 %v2666_v15, %v996_v0  ;;  %v870_v5 = vpop.f32.mrb[21].mxu0  ;;  %v998_v6 = vpop.f32.mrb[21].mxu1 }
 0x134   : > { %v871_v7 = vpop.f32.mrb[22].mxu0  ;;  %v999_v8 = vpop.f32.mrb[22].mxu1 }
 0x135   : > { %2153 = vst [vmem:[%s2686_s26 + $0x20] sm:$0xff] %v2013_v1   ;;  %2169 = vst [vmem:[%s2686_s26 + $0xa0] sm:$0xff] %v2093_v2   ;;  %v1171_v9 = vadd.f32 %v2671_v17, %v1100_v3  ;;  %v1203_v10 = vadd.f32 %v2671_v17, %v1132_v4  ;;  %v1101_v11 = vmul.f32 %v2666_v15, %v871_v7  ;;  %v873_v13 = vpop.f32.mrb[23].mxu0  ;;  %v1001_v14 = vpop.f32.mrb[23].mxu1 }
 0x136   : > { %v1133_v12 = vmul.f32 %v2666_v15, %v999_v8 }
 0x137   : > { %v1172_v16 = vadd.f32 %v2671_v17, %v1101_v11  ;;  %v1235_v19 = vmax.f32 %v1171_v9, 0.0  ;;  %v1267_v20 = vmax.f32 %v1203_v10, 0.0 }
 0x138   : > { %v1204_v18 = vadd.f32 %v2671_v17, %v1133_v12 }
 0x139   : > { %v1236_v21 = vmax.f32 %v1172_v16, 0.0 }
 0x13a   : > { %v1268_v22 = vmax.f32 %v1204_v18, 0.0  ;;  %v876_v23 = vpop.f32.mrb[24].mxu0  ;;  %v1004_v24 = vpop.f32.mrb[24].mxu1 }
 0x13b   : > { %v2018_v25 = vpack.c.bf16 %v1236_v21, %v1235_v19  ;;  %v1102_v27 = vmul.f32 %v2666_v15, %v876_v23  ;;  %v1134_v28 = vmul.f32 %v2666_v15, %v1004_v24  ;;  %v878_v29 = vpop.f32.mrb[25].mxu0  ;;  %v1006_v30 = vpop.f32.mrb[25].mxu1 }
 0x13c   : > { %v2098_v26 = vpack.c.bf16 %v1268_v22, %v1267_v20  ;;  %v879_v31 = vpop.f32.mrb[26].mxu0  ;;  %v1007_v32 = vpop.f32.mrb[26].mxu1 }
 0x13d   : > { %2154 = vst [vmem:[%s2686_s26 + $0x28] sm:$0xff] %v2018_v25   ;;  %v1173_v33 = vadd.f32 %v2671_v17, %v1102_v27  ;;  %v1205_v34 = vadd.f32 %v2671_v17, %v1134_v28  ;;  %v1103_v35 = vmul.f32 %v2666_v15, %v879_v31  ;;  %v1135_v36 = vmul.f32 %v2666_v15, %v1007_v32  ;;  %v881_v37 = vpop.f32.mrb[27].mxu0  ;;  %v1009_v38 = vpop.f32.mrb[27].mxu1 }
 0x13e   : > { %2170 = vst [vmem:[%s2686_s26 + $0xa8] sm:$0xff] %v2098_v26  }
 0x13f   : > { %v1174_v39 = vadd.f32 %v2671_v17, %v1103_v35  ;;  %v1206_v40 = vadd.f32 %v2671_v17, %v1135_v36  ;;  %v1237_v41 = vmax.f32 %v1173_v33, 0.0  ;;  %v1269_v42 = vmax.f32 %v1205_v34, 0.0 }
 0x141   : > { %v1238_v43 = vmax.f32 %v1174_v39, 0.0  ;;  %v1270_v44 = vmax.f32 %v1206_v40, 0.0 }
 0x142   : > { %v884_v45 = vpop.f32.mrb[28].mxu0  ;;  %v1012_v46 = vpop.f32.mrb[28].mxu1 }
 0x143   : > { %v2023_v47 = vpack.c.bf16 %v1238_v43, %v1237_v41  ;;  %v2103_v48 = vpack.c.bf16 %v1270_v44, %v1269_v42  ;;  %v1104_v49 = vmul.f32 %v2666_v15, %v884_v45  ;;  %v1136_v50 = vmul.f32 %v2666_v15, %v1012_v46  ;;  %v886_v51 = vpop.f32.mrb[29].mxu0  ;;  %v1014_v52 = vpop.f32.mrb[29].mxu1 }
 0x144   : > { %v887_v53 = vpop.f32.mrb[30].mxu0  ;;  %v1015_v54 = vpop.f32.mrb[30].mxu1 }
 0x145   : > { %2155 = vst [vmem:[%s2686_s26 + $0x30] sm:$0xff] %v2023_v47   ;;  %2171 = vst [vmem:[%s2686_s26 + $0xb0] sm:$0xff] %v2103_v48   ;;  %v1175_v55 = vadd.f32 %v2671_v17, %v1104_v49  ;;  %v1207_v56 = vadd.f32 %v2671_v17, %v1136_v50  ;;  %v1105_v57 = vmul.f32 %v2666_v15, %v887_v53  ;;  %v889_v59 = vpop.f32.mrb[31].mxu0  ;;  %v1017_v60 = vpop.f32.mrb[31].mxu1 }
 0x146   : > { %v1137_v58 = vmul.f32 %v2666_v15, %v1015_v54 }
 0x147   : > { %v1176_v61 = vadd.f32 %v2671_v17, %v1105_v57  ;;  %v1239_v63 = vmax.f32 %v1175_v55, 0.0  ;;  %v1271_v0 = vmax.f32 %v1207_v56, 0.0 }
 0x148   : > { %v1208_v62 = vadd.f32 %v2671_v17, %v1137_v58 }
 0x149   : > { %v1240_v1 = vmax.f32 %v1176_v61, 0.0 }
 0x14a   : > { %v1272_v2 = vmax.f32 %v1208_v62, 0.0  ;;  %v892_v3 = vpop.f32.mrb[32].mxu0  ;;  %v1020_v4 = vpop.f32.mrb[32].mxu1 }
 0x14b   : > { %v2028_v5 = vpack.c.bf16 %v1240_v1, %v1239_v63  ;;  %v1106_v7 = vmul.f32 %v2666_v15, %v892_v3  ;;  %v1138_v8 = vmul.f32 %v2666_v15, %v1020_v4  ;;  %v894_v9 = vpop.f32.mrb[33].mxu0  ;;  %v1022_v10 = vpop.f32.mrb[33].mxu1 }
 0x14c   : > { %v2108_v6 = vpack.c.bf16 %v1272_v2, %v1271_v0  ;;  %v895_v11 = vpop.f32.mrb[34].mxu0  ;;  %v1023_v12 = vpop.f32.mrb[34].mxu1 }
 0x14d   : > { %2156 = vst [vmem:[%s2686_s26 + $0x38] sm:$0xff] %v2028_v5   ;;  %v1177_v13 = vadd.f32 %v2671_v17, %v1106_v7  ;;  %v1209_v14 = vadd.f32 %v2671_v17, %v1138_v8  ;;  %v1107_v16 = vmul.f32 %v2666_v15, %v895_v11  ;;  %v1139_v18 = vmul.f32 %v2666_v15, %v1023_v12  ;;  %v897_v19 = vpop.f32.mrb[35].mxu0  ;;  %v1025_v20 = vpop.f32.mrb[35].mxu1 }
 0x14e   : > { %2172 = vst [vmem:[%s2686_s26 + $0xb8] sm:$0xff] %v2108_v6  }
 0x14f   : > { %v1178_v21 = vadd.f32 %v2671_v17, %v1107_v16  ;;  %v1210_v22 = vadd.f32 %v2671_v17, %v1139_v18  ;;  %v1241_v23 = vmax.f32 %v1177_v13, 0.0  ;;  %v1273_v24 = vmax.f32 %v1209_v14, 0.0 }
 0x151   : > { %v1242_v25 = vmax.f32 %v1178_v21, 0.0  ;;  %v1274_v26 = vmax.f32 %v1210_v22, 0.0 }
 0x152   : > { %v900_v27 = vpop.f32.mrb[36].mxu0  ;;  %v1028_v28 = vpop.f32.mrb[36].mxu1 }
 0x153   : > { %v2033_v29 = vpack.c.bf16 %v1242_v25, %v1241_v23  ;;  %v2113_v30 = vpack.c.bf16 %v1274_v26, %v1273_v24  ;;  %v1108_v31 = vmul.f32 %v2666_v15, %v900_v27  ;;  %v1140_v32 = vmul.f32 %v2666_v15, %v1028_v28  ;;  %v902_v33 = vpop.f32.mrb[37].mxu0  ;;  %v1030_v34 = vpop.f32.mrb[37].mxu1 }
 0x154   : > { %v903_v35 = vpop.f32.mrb[38].mxu0  ;;  %v1031_v36 = vpop.f32.mrb[38].mxu1 }
 0x155   : > { %2157 = vst [vmem:[%s2686_s26 + $0x40] sm:$0xff] %v2033_v29   ;;  %2173 = vst [vmem:[%s2686_s26 + $0xc0] sm:$0xff] %v2113_v30   ;;  %v1179_v37 = vadd.f32 %v2671_v17, %v1108_v31  ;;  %v1211_v38 = vadd.f32 %v2671_v17, %v1140_v32  ;;  %v1109_v39 = vmul.f32 %v2666_v15, %v903_v35  ;;  %v905_v41 = vpop.f32.mrb[39].mxu0  ;;  %v1033_v42 = vpop.f32.mrb[39].mxu1 }
 0x156   : > { %v1141_v40 = vmul.f32 %v2666_v15, %v1031_v36 }
 0x157   : > { %v1180_v43 = vadd.f32 %v2671_v17, %v1109_v39  ;;  %v1243_v45 = vmax.f32 %v1179_v37, 0.0  ;;  %v1275_v46 = vmax.f32 %v1211_v38, 0.0 }
 0x158   : > { %v1212_v44 = vadd.f32 %v2671_v17, %v1141_v40 }
 0x159   : > { %v1244_v47 = vmax.f32 %v1180_v43, 0.0 }
 0x15a   : > { %v1276_v48 = vmax.f32 %v1212_v44, 0.0  ;;  %v908_v49 = vpop.f32.mrb[40].mxu0  ;;  %v1036_v50 = vpop.f32.mrb[40].mxu1 }
 0x15b   : > { %v2038_v51 = vpack.c.bf16 %v1244_v47, %v1243_v45  ;;  %v1110_v53 = vmul.f32 %v2666_v15, %v908_v49  ;;  %v1142_v54 = vmul.f32 %v2666_v15, %v1036_v50  ;;  %v910_v55 = vpop.f32.mrb[41].mxu0  ;;  %v1038_v56 = vpop.f32.mrb[41].mxu1 }
 0x15c   : > { %v2118_v52 = vpack.c.bf16 %v1276_v48, %v1275_v46  ;;  %v911_v57 = vpop.f32.mrb[42].mxu0  ;;  %v1039_v58 = vpop.f32.mrb[42].mxu1 }
 0x15d   : > { %2158 = vst [vmem:[%s2686_s26 + $0x48] sm:$0xff] %v2038_v51   ;;  %v1181_v59 = vadd.f32 %v2671_v17, %v1110_v53  ;;  %v1213_v60 = vadd.f32 %v2671_v17, %v1142_v54  ;;  %v1111_v61 = vmul.f32 %v2666_v15, %v911_v57  ;;  %v1143_v62 = vmul.f32 %v2666_v15, %v1039_v58  ;;  %v913_v63 = vpop.f32.mrb[43].mxu0  ;;  %v1041_v0 = vpop.f32.mrb[43].mxu1 }
 0x15e   : > { %2174 = vst [vmem:[%s2686_s26 + $0xc8] sm:$0xff] %v2118_v52  }
 0x15f   : > { %v1182_v1 = vadd.f32 %v2671_v17, %v1111_v61  ;;  %v1214_v2 = vadd.f32 %v2671_v17, %v1143_v62  ;;  %v1245_v3 = vmax.f32 %v1181_v59, 0.0  ;;  %v1277_v4 = vmax.f32 %v1213_v60, 0.0 }
 0x161   : > { %v1246_v5 = vmax.f32 %v1182_v1, 0.0  ;;  %v1278_v6 = vmax.f32 %v1214_v2, 0.0 }
 0x162   : > { %v916_v7 = vpop.f32.mrb[44].mxu0  ;;  %v1044_v8 = vpop.f32.mrb[44].mxu1 }
 0x163   : > { %v2043_v9 = vpack.c.bf16 %v1246_v5, %v1245_v3  ;;  %v2123_v10 = vpack.c.bf16 %v1278_v6, %v1277_v4  ;;  %v1112_v11 = vmul.f32 %v2666_v15, %v916_v7  ;;  %v1144_v12 = vmul.f32 %v2666_v15, %v1044_v8  ;;  %v918_v13 = vpop.f32.mrb[45].mxu0  ;;  %v1046_v14 = vpop.f32.mrb[45].mxu1 }
 0x164   : > { %v919_v16 = vpop.f32.mrb[46].mxu0  ;;  %v1047_v18 = vpop.f32.mrb[46].mxu1 }
 0x165   : > { %2159 = vst [vmem:[%s2686_s26 + $0x50] sm:$0xff] %v2043_v9   ;;  %2175 = vst [vmem:[%s2686_s26 + $0xd0] sm:$0xff] %v2123_v10   ;;  %v1183_v19 = vadd.f32 %v2671_v17, %v1112_v11  ;;  %v1215_v20 = vadd.f32 %v2671_v17, %v1144_v12  ;;  %v1113_v21 = vmul.f32 %v2666_v15, %v919_v16  ;;  %v921_v23 = vpop.f32.mrb[47].mxu0  ;;  %v1049_v24 = vpop.f32.mrb[47].mxu1 }
 0x166   : > { %v1145_v22 = vmul.f32 %v2666_v15, %v1047_v18 }
 0x167   : > { %v1184_v25 = vadd.f32 %v2671_v17, %v1113_v21  ;;  %v1247_v27 = vmax.f32 %v1183_v19, 0.0  ;;  %v1279_v28 = vmax.f32 %v1215_v20, 0.0 }
 0x168   : > { %v1216_v26 = vadd.f32 %v2671_v17, %v1145_v22 }
 0x169   : > { %v1248_v29 = vmax.f32 %v1184_v25, 0.0 }
 0x16a   : > { %v1280_v30 = vmax.f32 %v1216_v26, 0.0  ;;  %v924_v31 = vpop.f32.mrb[48].mxu0  ;;  %v1052_v32 = vpop.f32.mrb[48].mxu1 }
 0x16b   : > { %v2048_v33 = vpack.c.bf16 %v1248_v29, %v1247_v27  ;;  %v1114_v35 = vmul.f32 %v2666_v15, %v924_v31  ;;  %v1146_v36 = vmul.f32 %v2666_v15, %v1052_v32  ;;  %v926_v37 = vpop.f32.mrb[49].mxu0  ;;  %v1054_v38 = vpop.f32.mrb[49].mxu1 }
 0x16c   : > { %v2128_v34 = vpack.c.bf16 %v1280_v30, %v1279_v28  ;;  %v927_v39 = vpop.f32.mrb[50].mxu0  ;;  %v1055_v40 = vpop.f32.mrb[50].mxu1 }
 0x16d   : > { %2160 = vst [vmem:[%s2686_s26 + $0x58] sm:$0xff] %v2048_v33   ;;  %v1185_v41 = vadd.f32 %v2671_v17, %v1114_v35  ;;  %v1217_v42 = vadd.f32 %v2671_v17, %v1146_v36  ;;  %v1115_v43 = vmul.f32 %v2666_v15, %v927_v39  ;;  %v1147_v44 = vmul.f32 %v2666_v15, %v1055_v40  ;;  %v929_v45 = vpop.f32.mrb[51].mxu0  ;;  %v1057_v46 = vpop.f32.mrb[51].mxu1 }
 0x16e   : > { %2176 = vst [vmem:[%s2686_s26 + $0xd8] sm:$0xff] %v2128_v34  }
 0x16f   : > { %v1186_v47 = vadd.f32 %v2671_v17, %v1115_v43  ;;  %v1218_v48 = vadd.f32 %v2671_v17, %v1147_v44  ;;  %v1249_v49 = vmax.f32 %v1185_v41, 0.0  ;;  %v1281_v50 = vmax.f32 %v1217_v42, 0.0 }
 0x171   : > { %v1250_v51 = vmax.f32 %v1186_v47, 0.0  ;;  %v1282_v52 = vmax.f32 %v1218_v48, 0.0 }
 0x172   : > { %v932_v53 = vpop.f32.mrb[52].mxu0  ;;  %v1060_v54 = vpop.f32.mrb[52].mxu1 }
 0x173   : > { %v2053_v55 = vpack.c.bf16 %v1250_v51, %v1249_v49  ;;  %v2133_v56 = vpack.c.bf16 %v1282_v52, %v1281_v50  ;;  %v1116_v57 = vmul.f32 %v2666_v15, %v932_v53  ;;  %v1148_v58 = vmul.f32 %v2666_v15, %v1060_v54  ;;  %v934_v59 = vpop.f32.mrb[53].mxu0  ;;  %v1062_v60 = vpop.f32.mrb[53].mxu1 }
 0x174   : > { %v935_v61 = vpop.f32.mrb[54].mxu0  ;;  %v1063_v62 = vpop.f32.mrb[54].mxu1 }
 0x175   : > { %2161 = vst [vmem:[%s2686_s26 + $0x60] sm:$0xff] %v2053_v55   ;;  %2177 = vst [vmem:[%s2686_s26 + $0xe0] sm:$0xff] %v2133_v56   ;;  %v1187_v63 = vadd.f32 %v2671_v17, %v1116_v57  ;;  %v1219_v0 = vadd.f32 %v2671_v17, %v1148_v58  ;;  %v1117_v1 = vmul.f32 %v2666_v15, %v935_v61  ;;  %v937_v3 = vpop.f32.mrb[55].mxu0  ;;  %v1065_v4 = vpop.f32.mrb[55].mxu1 }
 0x176   : > { %v1149_v2 = vmul.f32 %v2666_v15, %v1063_v62 }
 0x177   : > { %v1188_v5 = vadd.f32 %v2671_v17, %v1117_v1  ;;  %v1251_v7 = vmax.f32 %v1187_v63, 0.0  ;;  %v1283_v8 = vmax.f32 %v1219_v0, 0.0 }
 0x178   : > { %v1220_v6 = vadd.f32 %v2671_v17, %v1149_v2 }
 0x179   : > { %v1252_v9 = vmax.f32 %v1188_v5, 0.0 }
 0x17a   : > { %v1284_v10 = vmax.f32 %v1220_v6, 0.0  ;;  %v940_v11 = vpop.f32.mrb[56].mxu0  ;;  %v1068_v12 = vpop.f32.mrb[56].mxu1 }
 0x17b   : > { %v2058_v13 = vpack.c.bf16 %v1252_v9, %v1251_v7  ;;  %v1118_v16 = vmul.f32 %v2666_v15, %v940_v11  ;;  %v1150_v18 = vmul.f32 %v2666_v15, %v1068_v12  ;;  %v942_v19 = vpop.f32.mrb[57].mxu0  ;;  %v1070_v20 = vpop.f32.mrb[57].mxu1 }
 0x17c   : > { %v2138_v14 = vpack.c.bf16 %v1284_v10, %v1283_v8  ;;  %v943_v21 = vpop.f32.mrb[58].mxu0  ;;  %v1071_v22 = vpop.f32.mrb[58].mxu1 }
 0x17d   : > { %2162 = vst [vmem:[%s2686_s26 + $0x68] sm:$0xff] %v2058_v13   ;;  %v1189_v23 = vadd.f32 %v2671_v17, %v1118_v16  ;;  %v1221_v24 = vadd.f32 %v2671_v17, %v1150_v18  ;;  %v1119_v25 = vmul.f32 %v2666_v15, %v943_v21  ;;  %v1151_v26 = vmul.f32 %v2666_v15, %v1071_v22  ;;  %v945_v27 = vpop.f32.mrb[59].mxu0  ;;  %v1073_v28 = vpop.f32.mrb[59].mxu1 }
 0x17e   : > { %2178 = vst [vmem:[%s2686_s26 + $0xe8] sm:$0xff] %v2138_v14  }
 0x17f   : > { %v1190_v29 = vadd.f32 %v2671_v17, %v1119_v25  ;;  %v1222_v30 = vadd.f32 %v2671_v17, %v1151_v26  ;;  %v1253_v31 = vmax.f32 %v1189_v23, 0.0  ;;  %v1285_v32 = vmax.f32 %v1221_v24, 0.0 }
 0x181   : > { %v1254_v33 = vmax.f32 %v1190_v29, 0.0  ;;  %v1286_v34 = vmax.f32 %v1222_v30, 0.0 }
 0x182   : > { %v948_v35 = vpop.f32.mrb[60].mxu0  ;;  %v1076_v36 = vpop.f32.mrb[60].mxu1 }
 0x183   : > { %v2063_v37 = vpack.c.bf16 %v1254_v33, %v1253_v31  ;;  %v2143_v38 = vpack.c.bf16 %v1286_v34, %v1285_v32  ;;  %v1120_v39 = vmul.f32 %v2666_v15, %v948_v35  ;;  %v1152_v40 = vmul.f32 %v2666_v15, %v1076_v36  ;;  %v950_v41 = vpop.f32.mrb[61].mxu0  ;;  %v1078_v42 = vpop.f32.mrb[61].mxu1 }
 0x184   : > { %v951_v43 = vpop.f32.mrb[62].mxu0  ;;  %v1079_v44 = vpop.f32.mrb[62].mxu1 }
 0x185   : > { %2163 = vst [vmem:[%s2686_s26 + $0x70] sm:$0xff] %v2063_v37   ;;  %2179 = vst [vmem:[%s2686_s26 + $0xf0] sm:$0xff] %v2143_v38   ;;  %v1191_v45 = vadd.f32 %v2671_v17, %v1120_v39  ;;  %v1223_v46 = vadd.f32 %v2671_v17, %v1152_v40  ;;  %v1121_v47 = vmul.f32 %v2666_v15, %v951_v43  ;;  %v953_v49 = vpop.f32.mrb[63].mxu0  ;;  %v1081_v50 = vpop.f32.mrb[63].mxu1 }
 0x186   : > { %v1153_v48 = vmul.f32 %v2666_v15, %v1079_v44 }
 0x187   : > { %v1192_v51 = vadd.f32 %v2671_v17, %v1121_v47  ;;  %v1255_v53 = vmax.f32 %v1191_v45, 0.0  ;;  %v1287_v54 = vmax.f32 %v1223_v46, 0.0 }
 0x188   : > { %v1224_v52 = vadd.f32 %v2671_v17, %v1153_v48 }
 0x189   : > { %v1256_v55 = vmax.f32 %v1192_v51, 0.0 }
 0x18a   : > { %v1288_v56 = vmax.f32 %v1224_v52, 0.0 }
 0x18b   : > { %v2068_v15 = vpack.c.bf16 %v1256_v55, %v1255_v53 }
 0x18c   : > { %v2148_v57 = vpack.c.bf16 %v1288_v56, %v1287_v54 }
 0x18d   : > { %2164 = vst [vmem:[%s2686_s26 + $0x78] sm:$0xff] %v2068_v15  }
 0x18e   : > { %2180 = vst [vmem:[%s2686_s26 + $0xf8] sm:$0xff] %v2148_v57  }
 0x18f   : > { %2379 = shalt.err (!%p2376_p5)
}
 0x190   : > { %s2380_s12 = scalar_lea.hbm %s2841_s7, 4096  ;;  %s2384_s22 = scalar_lea.hbm %s2899_s4, 16384 }
 0x191   : > { %p2381_p6 = scmp.ne.s32.totalorder %s2841_s7, %s2380_s12  ;;  %p2385_p10 = scmp.lt.u32.totalorder %s2841_s7, %s2899_s4 }
 0x192   : > { %p2386_p11 = scmp.lt.u32.totalorder %s2384_s22, %s2380_s12  ;;  %p2388_p13 = scmp.lt.u32.totalorder %s2380_s12, %s2841_s7 }
 0x193   : > { %p2382_p7 = pnand %p2381_p6, %p2516_p4 }
 0x194   : > { %p2387_p12 = por %p2386_p11, %p2385_p10 }
 0x195   : > { %p2383_p9 = pneg %p2382_p7 }
 0x196   : > { %p2389_p0 = por %p2388_p13, %p2387_p12 }
 0x198   : > { %p2390_p1 = pnand %p2389_p0, %p2383_p9 }
 0x19a   : > { %2393 = shalt.err (!%p2390_p1)
}
 0x19b   : > { %s2449_s26 = smov 64   ;;  %s2450_s29 = smov 4  }
 0x19c   : > { %2201 = dma.vmem_to_hbm [thread:$0]  (%p2516_p4), %s2843_s30, 4096, %s2841_s7, %s2849_s18, %s2449_s26, %s2449_s26, %s2450_s29  }
 0x19d PF: > { %p2207_p2 = scmp.ge.s32.totalorder %s2444_s20, 2  ;;  %s1639_s5 = sand.u32 1, %s2424_s15  }
 0x19e   : > { %s1640_s6 = scalar_lea.sflag [#allocation3], %s1639_s5 }
 0x19f   : > { %p2204_p3 = pnand %p2207_p2, %p2523_p8 }
 0x1a1   : > { %2419 = dma.done.wait (!%p2204_p3), %s1640_s6, 4096  }
 0x1a2   : > { %2421 = vsyncadd (!%p2204_p3), %s1640_s6, 4294963200  ;;  %s17_s20 = sadd.s32 1, %s2444_s20   ;;  %s2902_s15 = smov %s2428_s16 }
 0x1a3   : > { %p14_p5 = scmp.ge.s32.totalorder %s17_s20, 6   ;;  %s2903_s16 = smov %s2432_s17 }
 0x1a4   : > { %s2904_s17 = smov %s2529_s28  ;;  %s2905_s18 = smov %s2440_s19 }
 0x1a5   : > { %s2906_s19 = smov %s2908_s23  ;;  %16 = sbr.rel (!%p14_p5) target bundleno = 4 (0x4), region = 80 }
 0x1ac   :  { %1645 = vsyncpa [#allocation3], 1 }
 0x1ad   :  { %1647 = vsyncpa [#allocation3 + $0x1], 1 }

</bundles_post_ra>
